<compile_context>
chip_gen: v7x
topology: tpu7x:2x2x1
jax: 0.10.0
libtpu: 0.0.40
codegen_flags: <defaults>
</compile_context>

<pallas_src>
import functools

import jax
import jax.numpy as jnp
from jax.experimental import pallas as pl
from jax.experimental.pallas import tpu as pltpu

_TM_MAX = 512                      # rows of the im2col matrix per grid step
_VMEM_BUDGET = 12 * 1024 * 1024    # conservative across v5e/v6e/v7x scoped VMEM
_EPS = 1e-5
_SLOPE = 0.2


# --------------------------------------------------------------------------
# Kernels
# --------------------------------------------------------------------------
def _conv_bias_act_kernel(p_ref, w_ref, b_ref, o_ref, *, slope):
    """First (no-BN) block: o = LeakyReLU(patches @ w + b), one M tile/step."""
    acc = jnp.dot(p_ref[...], w_ref[...], preferred_element_type=jnp.float32)
    acc = acc + b_ref[...]
    o_ref[...] = jnp.where(acc >= 0, acc, slope * acc).astype(o_ref.dtype)


def _conv_bn_act_kernel(p_ref, w_ref, g_ref, bt_ref, o_ref, sum_ref, sq_ref, *,
                        inv_m, tm, single_tile, eps, slope):
    """BN blocks, fully fused in one call.

    Per grid step: conv tile -> stored into the VMEM-resident output block;
    per-channel sum / sumsq accumulated in VMEM scratch.  Last step: compute
    batch mean/var (biased, training mode), apply gamma/beta + LeakyReLU to the
    whole resident output in place.  Conv bias is dropped (BN cancels it), so
    zero-padded M rows contribute exactly zero to the stats.
    """
    i = pl.program_id(0)

    @pl.when(i == 0)
    def _():
        sum_ref[...] = jnp.zeros_like(sum_ref)
        sq_ref[...] = jnp.zeros_like(sq_ref)

    conv = jnp.dot(p_ref[...], w_ref[...], preferred_element_type=jnp.float32)
    sum_ref[...] += jnp.sum(conv, axis=0, keepdims=True)
    sq_ref[...] += jnp.sum(conv * conv, axis=0, keepdims=True)

    if single_tile:                       # static (Python) branch
        o_ref[...] = conv.astype(o_ref.dtype)
    else:
        row0 = pl.multiple_of(i * tm, 8)
        o_ref[pl.ds(row0, tm), :] = conv.astype(o_ref.dtype)

    @pl.when(i == pl.num_programs(0) - 1)
    def _():
        mean = sum_ref[...] * inv_m
        var = jnp.maximum(sq_ref[...] * inv_m - mean * mean, 0.0)
        inv_std = jax.lax.rsqrt(var + eps)
        scale = g_ref[...] * inv_std
        shift = bt_ref[...] - mean * scale
        y = o_ref[...] * scale + shift
        o_ref[...] = jnp.where(y >= 0, y, slope * y).astype(o_ref.dtype)


# --------------------------------------------------------------------------
# Pallas-call wrappers
# --------------------------------------------------------------------------
def _plan_m(m):
    """Returns (padded M, tile M, grid_m); no padding at all when one tile."""
    if m <= _TM_MAX:
        return m, m, 1
    tm = _TM_MAX
    grid_m = (m + tm - 1) // tm
    return grid_m * tm, tm, grid_m


def _pad_rows(a, mp):
    m = a.shape[0]
    if mp == m:
        return a
    return jnp.pad(a, ((0, mp - m), (0, 0)))


def _conv_leaky_relu(patches, w2d, bias, *, slope=_SLOPE):
    m, k = patches.shape
    c = w2d.shape[1]
    mp, tm, grid_m = _plan_m(m)

    est = 2 * tm * k * 2 + 2 * k * c * 2 + 2 * tm * c * 4 + (1 << 16)
    if est > _VMEM_BUDGET:
        # TODO(synk): add a K-tiled accumulator path for layers whose working
        # set exceeds the VMEM budget.
        raise NotImplementedError("layer working set exceeds VMEM budget")

    p = _pad_rows(patches, mp)
    b = bias.reshape(1, c).astype(jnp.float32)

    out = pl.pallas_call(
        functools.partial(_conv_bias_act_kernel, slope=slope),
        out_shape=jax.ShapeDtypeStruct((mp, c), jnp.float32),
        grid=(grid_m,),
        in_specs=[
            pl.BlockSpec((tm, k), lambda i: (i, 0)),
            pl.BlockSpec((k, c), lambda i: (0, 0)),   # weight: constant index
            pl.BlockSpec((1, c), lambda i: (0, 0)),   # bias:   constant index
        ],
        out_specs=pl.BlockSpec((tm, c), lambda i: (i, 0)),
        compiler_params=pltpu.CompilerParams(
            dimension_semantics=("parallel",)),
    )(p, w2d, b)
    return out[:m] if mp != m else out


def _conv_bn_leaky_relu(patches, w2d, gamma, beta, *, eps=_EPS, slope=_SLOPE):
    m, k = patches.shape
    c = w2d.shape[1]
    mp, tm, grid_m = _plan_m(m)

    # Resident output + double-buffered patch tile + weight must fit in VMEM.
    est = mp * c * 4 + 2 * tm * k * 2 + 2 * k * c * 2 + (1 << 16)
    if est > _VMEM_BUDGET:
        # TODO(synk): fall back to a two-pass tiled pipeline (conv+stats, then
        # affine+activation) when the fused layer does not fit in VMEM.
        raise NotImplementedError("layer working set exceeds VMEM budget")

    p = _pad_rows(patches, mp)
    g = gamma.reshape(1, c).astype(jnp.float32)
    bt = beta.reshape(1, c).astype(jnp.float32)

    out = pl.pallas_call(
        functools.partial(_conv_bn_act_kernel, inv_m=1.0 / m, tm=tm,
                          single_tile=(grid_m == 1), eps=eps, slope=slope),
        out_shape=jax.ShapeDtypeStruct((mp, c), jnp.float32),
        grid=(grid_m,),
        in_specs=[
            pl.BlockSpec((tm, k), lambda i: (i, 0)),
            pl.BlockSpec((k, c), lambda i: (0, 0)),   # weight: constant index
            pl.BlockSpec((1, c), lambda i: (0, 0)),   # gamma
            pl.BlockSpec((1, c), lambda i: (0, 0)),   # beta
        ],
        # Full output stays VMEM-resident across all M steps (constant index),
        # so the BN apply never round-trips through HBM.
        out_specs=pl.BlockSpec((mp, c), lambda i: (0, 0)),
        scratch_shapes=[pltpu.VMEM((1, c), jnp.float32),
                        pltpu.VMEM((1, c), jnp.float32)],
        compiler_params=pltpu.CompilerParams(
            dimension_semantics=("arbitrary",)),
    )(p, w2d, g, bt)
    return out[:m] if mp != m else out


# --------------------------------------------------------------------------
# JAX glue: NHWC im2col (pure data movement) + whole-forward (jitted)
# --------------------------------------------------------------------------
def _im2col_nhwc(x, ksize, stride, padding):
    # TODO(synk): fuse this gather into the conv kernel so the KH*KW-duplicated
    # patches tensor is never materialized in HBM at real encoder scale.
    n, h, w, c = x.shape
    xp = jnp.pad(x, ((0, 0), (padding, padding), (padding, padding), (0, 0)))
    ho = (h + 2 * padding - ksize) // stride + 1
    wo = (w + 2 * padding - ksize) // stride + 1
    cols = []
    for i in range(ksize):
        for j in range(ksize):
            cols.append(xp[:, i:i + stride * ho:stride,
                           j:j + stride * wo:stride, :])
    patches = jnp.stack(cols, axis=-1)                  # (N, Ho, Wo, C, KH*KW)
    patches = patches.reshape(n * ho * wo, c * ksize * ksize)
    return patches, (n, ho, wo)


def _encoder_forward(x_nchw, params, *, ksize, stride, padding):
    x = jnp.transpose(x_nchw, (0, 2, 3, 1))             # NHWC between layers
    skips = []
    for i, (w, b, gamma, beta) in enumerate(params):
        cout = w.shape[0]
        # bf16 before the gather so the duplicated patches tensor is half-size.
        patches, (n, ho, wo) = _im2col_nhwc(x.astype(jnp.bfloat16),
                                            ksize, stride, padding)
        w2d = w.reshape(cout, -1).T.astype(jnp.bfloat16)  # (Cin*KH*KW, Cout)
        if i == 0:
            y = _conv_leaky_relu(patches, w2d, b)
        else:
            y = _conv_bn_leaky_relu(patches, w2d, gamma, beta)
        x = y.reshape(n, ho, wo, cout)                   # NHWC for next layer
        skips.append(jnp.transpose(x, (0, 3, 1, 2)))     # module-facing NCHW
    return skips[-1], skips


# --------------------------------------------------------------------------
# Encoder: deterministic parameter init + forward pass
# --------------------------------------------------------------------------
class EncoderPallas:
    def __init__(self, in_channel, features, kernel_size, stride, noise_dim,
                 padding, key):
        del noise_dim  # unused by the reference Encoder.forward as well
        self.features = list(features)
        self.kernel_size = int(kernel_size)
        self.stride = int(stride)
        self.padding = int(padding)
        self.params = []
        c_in = in_channel
        for c_out in self.features:
            key, wk, bk = jax.random.split(key, 3)
            fan_in = c_in * kernel_size * kernel_size
            bound = 1.0 / (fan_in ** 0.5)
            w = jax.random.uniform(wk, (c_out, c_in, kernel_size, kernel_size),
                                   jnp.float32, -bound, bound)   # PyTorch OIHW
            b = jax.random.uniform(bk, (c_out,), jnp.float32, -bound, bound)
            gamma = jnp.ones((c_out,), jnp.float32)               # BN defaults
            beta = jnp.zeros((c_out,), jnp.float32)
            self.params.append((w, b, gamma, beta))
            c_in = c_out
        self._forward = jax.jit(functools.partial(
            _encoder_forward, ksize=self.kernel_size, stride=self.stride,
            padding=self.padding))

    def __call__(self, x_nchw):
        return self._forward(x_nchw, tuple(self.params))


# --------------------------------------------------------------------------
# Pure-JAX f32 reference (training-mode BN semantics) for validation
# --------------------------------------------------------------------------
def _reference_forward(x, params, ksize, stride, padding):
    skips = []
    for i, (w, b, gamma, beta) in enumerate(params):
        x = jax.lax.conv_general_dilated(
            x, w, window_strides=(stride, stride),
            padding=[(padding, padding), (padding, padding)],
            dimension_numbers=("NCHW", "OIHW", "NCHW"))
        x = x + b.reshape(1, -1, 1, 1)
        if i > 0:
            mean = jnp.mean(x, axis=(0, 2, 3), keepdims=True)
            var = jnp.mean((x - mean) ** 2, axis=(0, 2, 3), keepdims=True)
            x = (x - mean) * jax.lax.rsqrt(var + _EPS)
            x = x * gamma.reshape(1, -1, 1, 1) + beta.reshape(1, -1, 1, 1)
        x = jnp.where(x >= 0, x, _SLOPE * x)
        skips.append(x)
    return x, skips


if __name__ == "__main__":
    key = jax.random.PRNGKey(0)
    key, xk, pk = jax.random.split(key, 3)

    in_channel = 4
    features = [8, 16, 32]
    kernel_size = 4
    stride = 2
    padding = 1
    noise_dim = 16  # unused by Encoder.forward

    x = jax.random.normal(xk, (2, in_channel, 16, 16), jnp.float32)

    enc = EncoderPallas(in_channel, features, kernel_size, stride, noise_dim,
                        padding, pk)
    out, skips = enc(x)
    out = jax.block_until_ready(out)
    skips = [jax.block_until_ready(s) for s in skips]

    expected = [(2, 8, 8, 8), (2, 16, 4, 4), (2, 32, 2, 2)]
    assert [tuple(s.shape) for s in skips] == expected, [s.shape for s in skips]
    assert tuple(out.shape) == expected[-1]
    assert bool(jnp.all(jnp.isfinite(out)))

    # Validate against a pure-JAX f32 reference (kernel uses bf16 MXU operands,
    # so compare with a loose normalized tolerance).
    ref_out, ref_skips = _reference_forward(x, enc.params, kernel_size,
                                            stride, padding)
    for got, ref in zip(skips, ref_skips):
        err = float(jnp.max(jnp.abs(got - ref)) /
                    (jnp.max(jnp.abs(ref)) + 1e-6))
        assert err < 0.2, f"normalized error too large: {err}"

    print("KERNEL_OK")
</pallas_src>

<mosaic_0001>
module attributes {stable_mosaic.version = 11 : i64} {
  func.func @_conv_bias_act_kernel(%arg0: i32, %arg1: memref<128x64xbf16, #tpu.memory_space<vmem>>, %arg2: memref<64x8xbf16, #tpu.memory_space<vmem>>, %arg3: memref<1x8xf32, #tpu.memory_space<vmem>>, %arg4: memref<128x8xf32, #tpu.memory_space<vmem>>) attributes {dimension_semantics = [#tpu.dimension_semantics<parallel>], iteration_bounds = array<i64: 1>, scalar_prefetch = 0 : i64, scratch_operands = 0 : i64, tpu.core_type = #tpu.core_type<tc>, window_params = [{transform_indices = @transform_0, window_bounds = array<i64: 128, 64>}, {pipeline_mode = #tpu.pipeline_mode<synchronous>, transform_indices = @transform_1, window_bounds = array<i64: 64, 8>}, {pipeline_mode = #tpu.pipeline_mode<synchronous>, transform_indices = @transform_2, window_bounds = array<i64: 1, 8>}, {transform_indices = @transform_3, window_bounds = array<i64: 128, 8>}]} {
    %c0 = arith.constant 0 : index
    %c0_0 = arith.constant 0 : index
    %0 = vector.load %arg1[%c0, %c0_0] : memref<128x64xbf16, #tpu.memory_space<vmem>>, vector<128x64xbf16>
    %c0_1 = arith.constant 0 : index
    %c0_2 = arith.constant 0 : index
    %1 = vector.load %arg2[%c0_1, %c0_2] : memref<64x8xbf16, #tpu.memory_space<vmem>>, vector<64x8xbf16>
    %cst = arith.constant dense<0.000000e+00> : vector<128x8xf32>
    %2 = tpu.matmul %0, %1, %cst {dimension_numbers = #tpu.dot_dimension_numbers<[1], [0], [0], [1], [0, 0, 1, 1], [], []>} : vector<128x64xbf16>, vector<64x8xbf16>, vector<128x8xf32> -> vector<128x8xf32>
    %c0_3 = arith.constant 0 : index
    %c0_4 = arith.constant 0 : index
    %3 = vector.load %arg3[%c0_3, %c0_4] : memref<1x8xf32, #tpu.memory_space<vmem>>, vector<1x8xf32>
    %4 = vector.broadcast %3 : vector<1x8xf32> to vector<128x8xf32>
    %5 = arith.addf %2, %4 : vector<128x8xf32>
    %cst_5 = arith.constant 0.000000e+00 : f32
    %6 = vector.broadcast %cst_5 : f32 to vector<128x8xf32>
    %7 = arith.cmpf oge, %5, %6 : vector<128x8xf32>
    %cst_6 = arith.constant 2.000000e-01 : f32
    %8 = vector.broadcast %cst_6 : f32 to vector<128x8xf32>
    %9 = arith.mulf %8, %5 : vector<128x8xf32>
    %10 = arith.select %7, %5, %9 : vector<128x8xi1>, vector<128x8xf32>
    %c0_7 = arith.constant 0 : index
    %c0_8 = arith.constant 0 : index
    %11 = vector.load %arg4[%c0_7, %c0_8] : memref<128x8xf32, #tpu.memory_space<vmem>>, vector<128x8xf32>
    tpu.vector_store %arg4[%c0_7, %c0_8], %10 {strides = array<i32>} : memref<128x8xf32, #tpu.memory_space<vmem>>, vector<128x8xf32>,
    return
  }
  func.func @transform_0(%arg0: i32) -> (i32, i32) {
    %c0_i32 = arith.constant 0 : i32
    %c0_i32_0 = arith.constant 0 : i32
    return %arg0, %c0_i32 : i32, i32
  }
  func.func @transform_1(%arg0: i32) -> (i32, i32) {
    %c0_i32 = arith.constant 0 : i32
    %c0_i32_0 = arith.constant 0 : i32
    %c0_i32_1 = arith.constant 0 : i32
    return %c0_i32, %c0_i32_0 : i32, i32
  }
  func.func @transform_2(%arg0: i32) -> (i32, i32) {
    %c0_i32 = arith.constant 0 : i32
    %c0_i32_0 = arith.constant 0 : i32
    %c0_i32_1 = arith.constant 0 : i32
    return %c0_i32, %c0_i32_0 : i32, i32
  }
  func.func @transform_3(%arg0: i32) -> (i32, i32) {
    %c0_i32 = arith.constant 0 : i32
    %c0_i32_0 = arith.constant 0 : i32
    return %arg0, %c0_i32 : i32, i32
  }
}

module attributes {stable_mosaic.version = 11 : i64} {
  func.func @_conv_bn_act_kernel(%arg0: i32, %arg1: memref<32x128xbf16, #tpu.memory_space<vmem>>, %arg2: memref<128x16xbf16, #tpu.memory_space<vmem>>, %arg3: memref<1x16xf32, #tpu.memory_space<vmem>>, %arg4: memref<1x16xf32, #tpu.memory_space<vmem>>, %arg5: memref<32x16xf32, #tpu.memory_space<vmem>>, %arg6: memref<1x16xf32, #tpu.memory_space<vmem>>, %arg7: memref<1x16xf32, #tpu.memory_space<vmem>>) attributes {dimension_semantics = [#tpu.dimension_semantics<arbitrary>], iteration_bounds = array<i64: 1>, scalar_prefetch = 0 : i64, scratch_operands = 2 : i64, tpu.core_type = #tpu.core_type<tc>, window_params = [{transform_indices = @transform_0, window_bounds = array<i64: 32, 128>}, {pipeline_mode = #tpu.pipeline_mode<synchronous>, transform_indices = @transform_1, window_bounds = array<i64: 128, 16>}, {pipeline_mode = #tpu.pipeline_mode<synchronous>, transform_indices = @transform_2, window_bounds = array<i64: 1, 16>}, {pipeline_mode = #tpu.pipeline_mode<synchronous>, transform_indices = @transform_3, window_bounds = array<i64: 1, 16>}, {pipeline_mode = #tpu.pipeline_mode<synchronous>, transform_indices = @transform_4, window_bounds = array<i64: 32, 16>}]} {
    %c0_i32 = arith.constant 0 : i32
    %0 = arith.cmpi eq, %arg0, %c0_i32 : i32
    %1 = arith.extui %0 : i1 to i32
    %c0_i32_0 = arith.constant 0 : i32
    %2 = arith.cmpi ne, %1, %c0_i32_0 : i32
    scf.if %2 {
      %cst_18 = arith.constant 0.000000e+00 : f32
      %21 = vector.broadcast %cst_18 : f32 to vector<1x16xf32>
      %c0_19 = arith.constant 0 : index
      %c0_20 = arith.constant 0 : index
      %22 = vector.load %arg6[%c0_19, %c0_20] : memref<1x16xf32, #tpu.memory_space<vmem>>, vector<1x16xf32>
      tpu.vector_store %arg6[%c0_19, %c0_20], %21 {strides = array<i32>} : memref<1x16xf32, #tpu.memory_space<vmem>>, vector<1x16xf32>,
      %cst_21 = arith.constant 0.000000e+00 : f32
      %23 = vector.broadcast %cst_21 : f32 to vector<1x16xf32>
      %c0_22 = arith.constant 0 : index
      %c0_23 = arith.constant 0 : index
      %24 = vector.load %arg7[%c0_22, %c0_23] : memref<1x16xf32, #tpu.memory_space<vmem>>, vector<1x16xf32>
      tpu.vector_store %arg7[%c0_22, %c0_23], %23 {strides = array<i32>} : memref<1x16xf32, #tpu.memory_space<vmem>>, vector<1x16xf32>,
    } else {
    }
    %c0 = arith.constant 0 : index
    %c0_1 = arith.constant 0 : index
    %3 = vector.load %arg1[%c0, %c0_1] : memref<32x128xbf16, #tpu.memory_space<vmem>>, vector<32x128xbf16>
    %c0_2 = arith.constant 0 : index
    %c0_3 = arith.constant 0 : index
    %4 = vector.load %arg2[%c0_2, %c0_3] : memref<128x16xbf16, #tpu.memory_space<vmem>>, vector<128x16xbf16>
    %cst = arith.constant dense<0.000000e+00> : vector<32x16xf32>
    %5 = tpu.matmul %3, %4, %cst {dimension_numbers = #tpu.dot_dimension_numbers<[1], [0], [0], [1], [0, 0, 1, 1], [], []>} : vector<32x128xbf16>, vector<128x16xbf16>, vector<32x16xf32> -> vector<32x16xf32>
    %c0_4 = arith.constant 0 : index
    %c0_5 = arith.constant 0 : index
    %6 = vector.load %arg6[%c0_4, %c0_5] : memref<1x16xf32, #tpu.memory_space<vmem>>, vector<1x16xf32>
    %cst_6 = arith.constant dense<0.000000e+00> : vector<16xf32>
    %7 = vector.multi_reduction <add>, %5, %cst_6 [0] : vector<32x16xf32> to vector<16xf32>
    %8 = vector.shape_cast %7 : vector<16xf32> to vector<1x16xf32>
    %9 = arith.addf %6, %8 : vector<1x16xf32>
    %c0_7 = arith.constant 0 : index
    %c0_8 = arith.constant 0 : index
    %10 = vector.load %arg6[%c0_7, %c0_8] : memref<1x16xf32, #tpu.memory_space<vmem>>, vector<1x16xf32>
    tpu.vector_store %arg6[%c0_7, %c0_8], %9 {strides = array<i32>} : memref<1x16xf32, #tpu.memory_space<vmem>>, vector<1x16xf32>,
    %c0_9 = arith.constant 0 : index
    %c0_10 = arith.constant 0 : index
    %11 = vector.load %arg7[%c0_9, %c0_10] : memref<1x16xf32, #tpu.memory_space<vmem>>, vector<1x16xf32>
    %12 = arith.mulf %5, %5 : vector<32x16xf32>
    %cst_11 = arith.constant dense<0.000000e+00> : vector<16xf32>
    %13 = vector.multi_reduction <add>, %12, %cst_11 [0] : vector<32x16xf32> to vector<16xf32>
    %14 = vector.shape_cast %13 : vector<16xf32> to vector<1x16xf32>
    %15 = arith.addf %11, %14 : vector<1x16xf32>
    %c0_12 = arith.constant 0 : index
    %c0_13 = arith.constant 0 : index
    %16 = vector.load %arg7[%c0_12, %c0_13] : memref<1x16xf32, #tpu.memory_space<vmem>>, vector<1x16xf32>
    tpu.vector_store %arg7[%c0_12, %c0_13], %15 {strides = array<i32>} : memref<1x16xf32, #tpu.memory_space<vmem>>, vector<1x16xf32>,
    %c0_14 = arith.constant 0 : index
    %c0_15 = arith.constant 0 : index
    %17 = vector.load %arg5[%c0_14, %c0_15] : memref<32x16xf32, #tpu.memory_space<vmem>>, vector<32x16xf32>
    tpu.vector_store %arg5[%c0_14, %c0_15], %5 {strides = array<i32>} : memref<32x16xf32, #tpu.memory_space<vmem>>, vector<32x16xf32>,
    %c0_i32_16 = arith.constant 0 : i32
    %18 = arith.cmpi eq, %arg0, %c0_i32_16 : i32
    %19 = arith.extui %18 : i1 to i32
    %c0_i32_17 = arith.constant 0 : i32
    %20 = arith.cmpi ne, %19, %c0_i32_17 : i32
    scf.if %20 {
      %c0_18 = arith.constant 0 : index
      %c0_19 = arith.constant 0 : index
      %21 = vector.load %arg6[%c0_18, %c0_19] : memref<1x16xf32, #tpu.memory_space<vmem>>, vector<1x16xf32>
      %cst_20 = arith.constant 3.125000e-02 : f32
      %22 = vector.broadcast %cst_20 : f32 to vector<1x16xf32>
      %23 = arith.mulf %21, %22 : vector<1x16xf32>
      %c0_21 = arith.constant 0 : index
      %c0_22 = arith.constant 0 : index
      %24 = vector.load %arg7[%c0_21, %c0_22] : memref<1x16xf32, #tpu.memory_space<vmem>>, vector<1x16xf32>
      %cst_23 = arith.constant 3.125000e-02 : f32
      %25 = vector.broadcast %cst_23 : f32 to vector<1x16xf32>
      %26 = arith.mulf %24, %25 : vector<1x16xf32>
      %27 = arith.mulf %23, %23 : vector<1x16xf32>
      %28 = arith.subf %26, %27 : vector<1x16xf32>
      %cst_24 = arith.constant 0.000000e+00 : f32
      %29 = vector.broadcast %cst_24 : f32 to vector<1x16xf32>
      %30 = arith.maximumf %28, %29 : vector<1x16xf32>
      %cst_25 = arith.constant 9.99999974E-6 : f32
      %31 = vector.broadcast %cst_25 : f32 to vector<1x16xf32>
      %32 = arith.addf %30, %31 : vector<1x16xf32>
      %33 = math.rsqrt %32 : vector<1x16xf32>
      %c0_26 = arith.constant 0 : index
      %c0_27 = arith.constant 0 : index
      %34 = vector.load %arg3[%c0_26, %c0_27] : memref<1x16xf32, #tpu.memory_space<vmem>>, vector<1x16xf32>
      %35 = arith.mulf %34, %33 : vector<1x16xf32>
      %c0_28 = arith.constant 0 : index
      %c0_29 = arith.constant 0 : index
      %36 = vector.load %arg4[%c0_28, %c0_29] : memref<1x16xf32, #tpu.memory_space<vmem>>, vector<1x16xf32>
      %37 = arith.mulf %23, %35 : vector<1x16xf32>
      %38 = arith.subf %36, %37 : vector<1x16xf32>
      %c0_30 = arith.constant 0 : index
      %c0_31 = arith.constant 0 : index
      %39 = vector.load %arg5[%c0_30, %c0_31] : memref<32x16xf32, #tpu.memory_space<vmem>>, vector<32x16xf32>
      %40 = vector.broadcast %35 : vector<1x16xf32> to vector<32x16xf32>
      %41 = arith.mulf %39, %40 : vector<32x16xf32>
      %42 = vector.broadcast %38 : vector<1x16xf32> to vector<32x16xf32>
      %43 = arith.addf %41, %42 : vector<32x16xf32>
      %cst_32 = arith.constant 0.000000e+00 : f32
      %44 = vector.broadcast %cst_32 : f32 to vector<32x16xf32>
      %45 = arith.cmpf oge, %43, %44 : vector<32x16xf32>
      %cst_33 = arith.constant 2.000000e-01 : f32
      %46 = vector.broadcast %cst_33 : f32 to vector<32x16xf32>
      %47 = arith.mulf %46, %43 : vector<32x16xf32>
      %48 = arith.select %45, %43, %47 : vector<32x16xi1>, vector<32x16xf32>
      %c0_34 = arith.constant 0 : index
      %c0_35 = arith.constant 0 : index
      %49 = vector.load %arg5[%c0_34, %c0_35] : memref<32x16xf32, #tpu.memory_space<vmem>>, vector<32x16xf32>
      tpu.vector_store %arg5[%c0_34, %c0_35], %48 {strides = array<i32>} : memref<32x16xf32, #tpu.memory_space<vmem>>, vector<32x16xf32>,
    } else {
    }
    return
  }
  func.func @transform_0(%arg0: i32) -> (i32, i32) {
    %c0_i32 = arith.constant 0 : i32
    %c0_i32_0 = arith.constant 0 : i32
    return %arg0, %c0_i32 : i32, i32
  }
  func.func @transform_1(%arg0: i32) -> (i32, i32) {
    %c0_i32 = arith.constant 0 : i32
    %c0_i32_0 = arith.constant 0 : i32
    %c0_i32_1 = arith.constant 0 : i32
    return %c0_i32, %c0_i32_0 : i32, i32
  }
  func.func @transform_2(%arg0: i32) -> (i32, i32) {
    %c0_i32 = arith.constant 0 : i32
    %c0_i32_0 = arith.constant 0 : i32
    %c0_i32_1 = arith.constant 0 : i32
    return %c0_i32, %c0_i32_0 : i32, i32
  }
  func.func @transform_3(%arg0: i32) -> (i32, i32) {
    %c0_i32 = arith.constant 0 : i32
    %c0_i32_0 = arith.constant 0 : i32
    %c0_i32_1 = arith.constant 0 : i32
    return %c0_i32, %c0_i32_0 : i32, i32
  }
  func.func @transform_4(%arg0: i32) -> (i32, i32) {
    %c0_i32 = arith.constant 0 : i32
    %c0_i32_0 = arith.constant 0 : i32
    %c0_i32_1 = arith.constant 0 : i32
    return %c0_i32, %c0_i32_0 : i32, i32
  }
}

module attributes {stable_mosaic.version = 11 : i64} {
  func.func @_conv_bn_act_kernel(%arg0: i32, %arg1: memref<8x256xbf16, #tpu.memory_space<vmem>>, %arg2: memref<256x32xbf16, #tpu.memory_space<vmem>>, %arg3: memref<1x32xf32, #tpu.memory_space<vmem>>, %arg4: memref<1x32xf32, #tpu.memory_space<vmem>>, %arg5: memref<8x32xf32, #tpu.memory_space<vmem>>, %arg6: memref<1x32xf32, #tpu.memory_space<vmem>>, %arg7: memref<1x32xf32, #tpu.memory_space<vmem>>) attributes {dimension_semantics = [#tpu.dimension_semantics<arbitrary>], iteration_bounds = array<i64: 1>, scalar_prefetch = 0 : i64, scratch_operands = 2 : i64, tpu.core_type = #tpu.core_type<tc>, window_params = [{transform_indices = @transform_0, window_bounds = array<i64: 8, 256>}, {pipeline_mode = #tpu.pipeline_mode<synchronous>, transform_indices = @transform_1, window_bounds = array<i64: 256, 32>}, {pipeline_mode = #tpu.pipeline_mode<synchronous>, transform_indices = @transform_2, window_bounds = array<i64: 1, 32>}, {pipeline_mode = #tpu.pipeline_mode<synchronous>, transform_indices = @transform_3, window_bounds = array<i64: 1, 32>}, {pipeline_mode = #tpu.pipeline_mode<synchronous>, transform_indices = @transform_4, window_bounds = array<i64: 8, 32>}]} {
    %c0_i32 = arith.constant 0 : i32
    %0 = arith.cmpi eq, %arg0, %c0_i32 : i32
    %1 = arith.extui %0 : i1 to i32
    %c0_i32_0 = arith.constant 0 : i32
    %2 = arith.cmpi ne, %1, %c0_i32_0 : i32
    scf.if %2 {
      %cst_18 = arith.constant 0.000000e+00 : f32
      %21 = vector.broadcast %cst_18 : f32 to vector<1x32xf32>
      %c0_19 = arith.constant 0 : index
      %c0_20 = arith.constant 0 : index
      %22 = vector.load %arg6[%c0_19, %c0_20] : memref<1x32xf32, #tpu.memory_space<vmem>>, vector<1x32xf32>
      tpu.vector_store %arg6[%c0_19, %c0_20], %21 {strides = array<i32>} : memref<1x32xf32, #tpu.memory_space<vmem>>, vector<1x32xf32>,
      %cst_21 = arith.constant 0.000000e+00 : f32
      %23 = vector.broadcast %cst_21 : f32 to vector<1x32xf32>
      %c0_22 = arith.constant 0 : index
      %c0_23 = arith.constant 0 : index
      %24 = vector.load %arg7[%c0_22, %c0_23] : memref<1x32xf32, #tpu.memory_space<vmem>>, vector<1x32xf32>
      tpu.vector_store %arg7[%c0_22, %c0_23], %23 {strides = array<i32>} : memref<1x32xf32, #tpu.memory_space<vmem>>, vector<1x32xf32>,
    } else {
    }
    %c0 = arith.constant 0 : index
    %c0_1 = arith.constant 0 : index
    %3 = vector.load %arg1[%c0, %c0_1] : memref<8x256xbf16, #tpu.memory_space<vmem>>, vector<8x256xbf16>
    %c0_2 = arith.constant 0 : index
    %c0_3 = arith.constant 0 : index
    %4 = vector.load %arg2[%c0_2, %c0_3] : memref<256x32xbf16, #tpu.memory_space<vmem>>, vector<256x32xbf16>
    %cst = arith.constant dense<0.000000e+00> : vector<8x32xf32>
    %5 = tpu.matmul %3, %4, %cst {dimension_numbers = #tpu.dot_dimension_numbers<[1], [0], [0], [1], [0, 0, 1, 1], [], []>} : vector<8x256xbf16>, vector<256x32xbf16>, vector<8x32xf32> -> vector<8x32xf32>
    %c0_4 = arith.constant 0 : index
    %c0_5 = arith.constant 0 : index
    %6 = vector.load %arg6[%c0_4, %c0_5] : memref<1x32xf32, #tpu.memory_space<vmem>>, vector<1x32xf32>
    %cst_6 = arith.constant dense<0.000000e+00> : vector<32xf32>
    %7 = vector.multi_reduction <add>, %5, %cst_6 [0] : vector<8x32xf32> to vector<32xf32>
    %8 = vector.shape_cast %7 : vector<32xf32> to vector<1x32xf32>
    %9 = arith.addf %6, %8 : vector<1x32xf32>
    %c0_7 = arith.constant 0 : index
    %c0_8 = arith.constant 0 : index
    %10 = vector.load %arg6[%c0_7, %c0_8] : memref<1x32xf32, #tpu.memory_space<vmem>>, vector<1x32xf32>
    tpu.vector_store %arg6[%c0_7, %c0_8], %9 {strides = array<i32>} : memref<1x32xf32, #tpu.memory_space<vmem>>, vector<1x32xf32>,
    %c0_9 = arith.constant 0 : index
    %c0_10 = arith.constant 0 : index
    %11 = vector.load %arg7[%c0_9, %c0_10] : memref<1x32xf32, #tpu.memory_space<vmem>>, vector<1x32xf32>
    %12 = arith.mulf %5, %5 : vector<8x32xf32>
    %cst_11 = arith.constant dense<0.000000e+00> : vector<32xf32>
    %13 = vector.multi_reduction <add>, %12, %cst_11 [0] : vector<8x32xf32> to vector<32xf32>
    %14 = vector.shape_cast %13 : vector<32xf32> to vector<1x32xf32>
    %15 = arith.addf %11, %14 : vector<1x32xf32>
    %c0_12 = arith.constant 0 : index
    %c0_13 = arith.constant 0 : index
    %16 = vector.load %arg7[%c0_12, %c0_13] : memref<1x32xf32, #tpu.memory_space<vmem>>, vector<1x32xf32>
    tpu.vector_store %arg7[%c0_12, %c0_13], %15 {strides = array<i32>} : memref<1x32xf32, #tpu.memory_space<vmem>>, vector<1x32xf32>,
    %c0_14 = arith.constant 0 : index
    %c0_15 = arith.constant 0 : index
    %17 = vector.load %arg5[%c0_14, %c0_15] : memref<8x32xf32, #tpu.memory_space<vmem>>, vector<8x32xf32>
    tpu.vector_store %arg5[%c0_14, %c0_15], %5 {strides = array<i32>} : memref<8x32xf32, #tpu.memory_space<vmem>>, vector<8x32xf32>,
    %c0_i32_16 = arith.constant 0 : i32
    %18 = arith.cmpi eq, %arg0, %c0_i32_16 : i32
    %19 = arith.extui %18 : i1 to i32
    %c0_i32_17 = arith.constant 0 : i32
    %20 = arith.cmpi ne, %19, %c0_i32_17 : i32
    scf.if %20 {
      %c0_18 = arith.constant 0 : index
      %c0_19 = arith.constant 0 : index
      %21 = vector.load %arg6[%c0_18, %c0_19] : memref<1x32xf32, #tpu.memory_space<vmem>>, vector<1x32xf32>
      %cst_20 = arith.constant 1.250000e-01 : f32
      %22 = vector.broadcast %cst_20 : f32 to vector<1x32xf32>
      %23 = arith.mulf %21, %22 : vector<1x32xf32>
      %c0_21 = arith.constant 0 : index
      %c0_22 = arith.constant 0 : index
      %24 = vector.load %arg7[%c0_21, %c0_22] : memref<1x32xf32, #tpu.memory_space<vmem>>, vector<1x32xf32>
      %cst_23 = arith.constant 1.250000e-01 : f32
      %25 = vector.broadcast %cst_23 : f32 to vector<1x32xf32>
      %26 = arith.mulf %24, %25 : vector<1x32xf32>
      %27 = arith.mulf %23, %23 : vector<1x32xf32>
      %28 = arith.subf %26, %27 : vector<1x32xf32>
      %cst_24 = arith.constant 0.000000e+00 : f32
      %29 = vector.broadcast %cst_24 : f32 to vector<1x32xf32>
      %30 = arith.maximumf %28, %29 : vector<1x32xf32>
      %cst_25 = arith.constant 9.99999974E-6 : f32
      %31 = vector.broadcast %cst_25 : f32 to vector<1x32xf32>
      %32 = arith.addf %30, %31 : vector<1x32xf32>
      %33 = math.rsqrt %32 : vector<1x32xf32>
      %c0_26 = arith.constant 0 : index
      %c0_27 = arith.constant 0 : index
      %34 = vector.load %arg3[%c0_26, %c0_27] : memref<1x32xf32, #tpu.memory_space<vmem>>, vector<1x32xf32>
      %35 = arith.mulf %34, %33 : vector<1x32xf32>
      %c0_28 = arith.constant 0 : index
      %c0_29 = arith.constant 0 : index
      %36 = vector.load %arg4[%c0_28, %c0_29] : memref<1x32xf32, #tpu.memory_space<vmem>>, vector<1x32xf32>
      %37 = arith.mulf %23, %35 : vector<1x32xf32>
      %38 = arith.subf %36, %37 : vector<1x32xf32>
      %c0_30 = arith.constant 0 : index
      %c0_31 = arith.constant 0 : index
      %39 = vector.load %arg5[%c0_30, %c0_31] : memref<8x32xf32, #tpu.memory_space<vmem>>, vector<8x32xf32>
      %40 = vector.broadcast %35 : vector<1x32xf32> to vector<8x32xf32>
      %41 = arith.mulf %39, %40 : vector<8x32xf32>
      %42 = vector.broadcast %38 : vector<1x32xf32> to vector<8x32xf32>
      %43 = arith.addf %41, %42 : vector<8x32xf32>
      %cst_32 = arith.constant 0.000000e+00 : f32
      %44 = vector.broadcast %cst_32 : f32 to vector<8x32xf32>
      %45 = arith.cmpf oge, %43, %44 : vector<8x32xf32>
      %cst_33 = arith.constant 2.000000e-01 : f32
      %46 = vector.broadcast %cst_33 : f32 to vector<8x32xf32>
      %47 = arith.mulf %46, %43 : vector<8x32xf32>
      %48 = arith.select %45, %43, %47 : vector<8x32xi1>, vector<8x32xf32>
      %c0_34 = arith.constant 0 : index
      %c0_35 = arith.constant 0 : index
      %49 = vector.load %arg5[%c0_34, %c0_35] : memref<8x32xf32, #tpu.memory_space<vmem>>, vector<8x32xf32>
      tpu.vector_store %arg5[%c0_34, %c0_35], %48 {strides = array<i32>} : memref<8x32xf32, #tpu.memory_space<vmem>>, vector<8x32xf32>,
    } else {
    }
    return
  }
  func.func @transform_0(%arg0: i32) -> (i32, i32) {
    %c0_i32 = arith.constant 0 : i32
    %c0_i32_0 = arith.constant 0 : i32
    return %arg0, %c0_i32 : i32, i32
  }
  func.func @transform_1(%arg0: i32) -> (i32, i32) {
    %c0_i32 = arith.constant 0 : i32
    %c0_i32_0 = arith.constant 0 : i32
    %c0_i32_1 = arith.constant 0 : i32
    return %c0_i32, %c0_i32_0 : i32, i32
  }
  func.func @transform_2(%arg0: i32) -> (i32, i32) {
    %c0_i32 = arith.constant 0 : i32
    %c0_i32_0 = arith.constant 0 : i32
    %c0_i32_1 = arith.constant 0 : i32
    return %c0_i32, %c0_i32_0 : i32, i32
  }
  func.func @transform_3(%arg0: i32) -> (i32, i32) {
    %c0_i32 = arith.constant 0 : i32
    %c0_i32_0 = arith.constant 0 : i32
    %c0_i32_1 = arith.constant 0 : i32
    return %c0_i32, %c0_i32_0 : i32, i32
  }
  func.func @transform_4(%arg0: i32) -> (i32, i32) {
    %c0_i32 = arith.constant 0 : i32
    %c0_i32_0 = arith.constant 0 : i32
    %c0_i32_1 = arith.constant 0 : i32
    return %c0_i32, %c0_i32_0 : i32, i32
  }
}

</mosaic_0001>

<bundles_post_ra>
// kernel: _encoder_forward.3
= control target key start
LH: loop header
LB: loop body
LE: loop exit
PB: predicated region body
PF: predicated region fallthrough
CT: control target
= control target key end

     0   :  { %vm110_vm0 = vcmask 523264   ;;  %vm280_vm1 = vcmask 64512   ;;  %s527_s1 = inlined_call_operand.vmem [shape: bf16[64,8], index: 1, kind: input, shape index: {}]   ;;  %s528_s0 = inlined_call_operand.vmem [shape: bf16[128,64], index: 0, kind: input, shape index: {}]   ;;  %s529_s2 = inlined_call_operand.vmem [shape: f32[1,8], index: 2, kind: input, shape index: {}]   ;;  %s530_s3 = inlined_call_operand.vmem [shape: f32[128,8], index: 3, kind: output, shape index: {}]  }
   0x1   :  { %v366_v0 = vld [vmem:[%s527_s1] sm:$0xff]   ;;  %v367_v1 = vld [vmem:[%s527_s1 + $0x8] sm:$0xff]   ;;  %v368_v2 = vld [vmem:[%s527_s1 + $0x10] sm:$0xff]  }
   0x2   :  { %334 = vmatprep.subr.bf16.mxu0 %v366_v0  ;;  %358 = vmatprep.subr.bf16.mxu1 %v366_v0  ;;  %v370_v3 = vld [vmem:[%s528_s0] sm:$0xff]   ;;  %v369_v5 = vld [vmem:[%s527_s1 + $0x18] sm:$0xff]   ;;  %v372_v6 = vld [vmem:[%s528_s0 + $0x8] sm:$0xff]  }
   0x3   :  { %335 = vmatpush3.bf16.msra.mxu0 %v366_v0  ;;  %362 = vmatpush3.bf16.msra.mxu1 %v366_v0  ;;  %v371_v4 = vld [vmem:[%s528_s0 + $0x20] sm:$0xff]   ;;  %v373_v7 = vld [vmem:[%s528_s0 + $0x28] sm:$0xff]   ;;  %v374_v8 = vld [vmem:[%s528_s0 + $0x10] sm:$0xff]  }
   0x4   :  { %336 = vmatprep.subr.bf16.mxu0 %v367_v1  ;;  %359 = vmatprep.subr.bf16.mxu1 %v367_v1  ;;  %v375_v9 = vld [vmem:[%s528_s0 + $0x30] sm:$0xff]   ;;  %v376_v10 = vld [vmem:[%s528_s0 + $0x18] sm:$0xff]   ;;  %v445_v12 = vld [vmem:[%s529_s2] ss:$0 sm:$0xff] }
   0x5   :  { %342 = vmatprep.mubr.msk.bf16.mxu0 %vm110_vm0, %v370_v3  ;;  %350 = vmatprep.mubr.msk.bf16.mxu1 %vm110_vm0, %v371_v4  ;;  %v377_v11 = vld [vmem:[%s528_s0 + $0x38] sm:$0xff]  }
   0x7   :  { %337 = vmatpush3.bf16.msra.mxu0 %v367_v1  ;;  %363 = vmatpush3.bf16.msra.mxu1 %v367_v1 }
   0x8   :  { %338 = vmatprep.subr.bf16.mxu0 %v368_v2  ;;  %360 = vmatprep.subr.bf16.mxu1 %v368_v2 }
   0xb   :  { %339 = vmatpush3.bf16.msra.mxu0 %v368_v2  ;;  %364 = vmatpush3.bf16.msra.mxu1 %v368_v2 }
   0xc   :  { %340 = vmatprep.subr.bf16.mxu0 %v369_v5  ;;  %361 = vmatprep.subr.bf16.mxu1 %v369_v5 }
   0xf   :  { %341 = vmatpush3.bf16.msra.mxu0 %v369_v5  ;;  %365 = vmatpush3.bf16.msra.mxu1 %v369_v5 }
  0x12   :  { %343 = vmatmul.mubr.msk.bf16.vlgmr.msra.gmra.mrb[0].mxu0 %vm110_vm0, %v372_v6  ;;  %351 = vmatmul.mubr.msk.bf16.vlgmr.msra.gmra.mrb[0].mxu1 %vm110_vm0, %v373_v7 }
  0x13   :  { %346 = vmatprep.mubr.msk.bf16.mxu0 %vm110_vm0, %v374_v8  ;;  %354 = vmatprep.mubr.msk.bf16.mxu1 %vm110_vm0, %v375_v9 }
  0x1a   :  { %347 = vmatmul.mubr.msk.bf16.gmra.mrb[4].mxu0 %vm110_vm0, %v376_v10  ;;  %355 = vmatmul.mubr.msk.bf16.gmra.mrb[4].mxu1 %vm110_vm0, %v377_v11 }
  0xe5   :  { %v344_v13 = vpop.f32.mrb[0].mxu0  ;;  %v352_v14 = vpop.f32.mrb[0].mxu1 }
  0xe6   :  { %v178_v15 = vadd.f32 %v344_v13, %v445_v12  ;;  %v210_v16 = vadd.f32 %v352_v14, %v445_v12  ;;  %v169_v17 = vpop.f32.mrb[1].mxu0  ;;  %v201_v18 = vpop.f32.mrb[1].mxu1 }
  0xe7   :  { %v170_v19 = vadd.f32 %v445_v12, %v169_v17  ;;  %v202_v20 = vadd.f32 %v445_v12, %v201_v18  ;;  %v345_v21 = vpop.f32.mrb[2].mxu0  ;;  %v353_v22 = vpop.f32.mrb[2].mxu1 }
  0xe8   :  { %vm234_vm2 = vcmp.ge.f32.partialorder %v178_v15, 0.0  ;;  %v250_v23 = vmul.f32 0.2, %v178_v15  ;;  %vm242_vm3 = vcmp.ge.f32.partialorder %v210_v16, 0.0  ;;  %v258_v24 = vmul.f32 0.2, %v210_v16 }
  0xe9   :  { %vm232_vm4 = vcmp.ge.f32.partialorder %v170_v19, 0.0  ;;  %v248_v25 = vmul.f32 0.2, %v170_v19  ;;  %vm240_vm5 = vcmp.ge.f32.partialorder %v202_v20, 0.0  ;;  %v256_v26 = vmul.f32 0.2, %v202_v20 }
  0xea   :  { %v266_v27 = vsel %vm234_vm2, %v178_v15, %v250_v23  ;;  %v274_v28 = vsel %vm242_vm3, %v210_v16, %v258_v24  ;;  %v181_v29 = vadd.f32 %v345_v21, %v445_v12  ;;  %v213_v30 = vadd.f32 %v353_v22, %v445_v12  ;;  %v172_v31 = vpop.f32.mrb[3].mxu0  ;;  %v204_v32 = vpop.f32.mrb[3].mxu1 }
  0xeb   :  { %283 = vst.msk [vmem:[%s530_s3 + $0x10] sm:$0xff] %vm280_vm1, %v266_v27  ;;  %291 = vst.msk [vmem:[%s530_s3 + $0x50] sm:$0xff] %vm280_vm1, %v274_v28  ;;  %v264_v33 = vsel %vm232_vm4, %v170_v19, %v248_v25  ;;  %v272_v34 = vsel %vm240_vm5, %v202_v20, %v256_v26  ;;  %v173_v35 = vadd.f32 %v445_v12, %v172_v31 }
  0xec   :  { %v205_v36 = vadd.f32 %v445_v12, %v204_v32  ;;  %281 = vst.msk [vmem:[%s530_s3] sm:$0xff] %vm280_vm1, %v264_v33  ;;  %289 = vst.msk [vmem:[%s530_s3 + $0x40] sm:$0xff] %vm280_vm1, %v272_v34  ;;  %vm235_vm6 = vcmp.ge.f32.partialorder %v181_v29, 0.0  ;;  %v251_v37 = vmul.f32 0.2, %v181_v29  ;;  %vm243_vm7 = vcmp.ge.f32.partialorder %v213_v30, 0.0 }
  0xed   :  { %v259_v38 = vmul.f32 0.2, %v213_v30  ;;  %vm233_vm8 = vcmp.ge.f32.partialorder %v173_v35, 0.0  ;;  %v249_v39 = vmul.f32 0.2, %v173_v35  ;;  %v348_v43 = vpop.f32.mrb[4].mxu0 }
  0xee   :  { %vm241_vm9 = vcmp.ge.f32.partialorder %v205_v36, 0.0  ;;  %v257_v40 = vmul.f32 0.2, %v205_v36  ;;  %v267_v41 = vsel %vm235_vm6, %v181_v29, %v251_v37  ;;  %v356_v44 = vpop.f32.mrb[4].mxu1  ;;  %v194_v47 = vadd.f32 %v348_v43, %v445_v12  ;;  %v185_v49 = vpop.f32.mrb[5].mxu0 }
  0xef   :  { %v275_v42 = vsel %vm243_vm7, %v213_v30, %v259_v38  ;;  %284 = vst.msk [vmem:[%s530_s3 + $0x18] sm:$0xff] %vm280_vm1, %v267_v41  ;;  %v265_v45 = vsel %vm233_vm8, %v173_v35, %v249_v39  ;;  %v226_v48 = vadd.f32 %v356_v44, %v445_v12  ;;  %v217_v50 = vpop.f32.mrb[5].mxu1  ;;  %v186_v51 = vadd.f32 %v445_v12, %v185_v49  ;;  %v349_v53 = vpop.f32.mrb[6].mxu0 }
  0xf0   :  { %292 = vst.msk [vmem:[%s530_s3 + $0x58] sm:$0xff] %vm280_vm1, %v275_v42  ;;  %v273_v46 = vsel %vm241_vm9, %v205_v36, %v257_v40  ;;  %282 = vst.msk [vmem:[%s530_s3 + $0x8] sm:$0xff] %vm280_vm1, %v265_v45  ;;  %v218_v52 = vadd.f32 %v445_v12, %v217_v50  ;;  %v357_v54 = vpop.f32.mrb[6].mxu1  ;;  %vm238_vm10 = vcmp.ge.f32.partialorder %v194_v47, 0.0  ;;  %v254_v55 = vmul.f32 0.2, %v194_v47 }
  0xf1   :  { %290 = vst.msk [vmem:[%s530_s3 + $0x48] sm:$0xff] %vm280_vm1, %v273_v46  ;;  %vm246_vm11 = vcmp.ge.f32.partialorder %v226_v48, 0.0  ;;  %v262_v56 = vmul.f32 0.2, %v226_v48  ;;  %vm236_vm12 = vcmp.ge.f32.partialorder %v186_v51, 0.0  ;;  %v197_v61 = vadd.f32 %v349_v53, %v445_v12  ;;  %v188_v63 = vpop.f32.mrb[7].mxu0 }
  0xf2   :  { %v252_v57 = vmul.f32 0.2, %v186_v51  ;;  %vm244_vm13 = vcmp.ge.f32.partialorder %v218_v52, 0.0  ;;  %v260_v58 = vmul.f32 0.2, %v218_v52  ;;  %v270_v59 = vsel %vm238_vm10, %v194_v47, %v254_v55  ;;  %v220_v0 = vpop.f32.mrb[7].mxu1 }
  0xf3   :  { %v278_v60 = vsel %vm246_vm11, %v226_v48, %v262_v56  ;;  %v229_v62 = vadd.f32 %v357_v54, %v445_v12  ;;  %287 = vst.msk [vmem:[%s530_s3 + $0x30] sm:$0xff] %vm280_vm1, %v270_v59  ;;  %v189_v3 = vadd.f32 %v445_v12, %v188_v63  ;;  %v221_v4 = vadd.f32 %v445_v12, %v220_v0 }
  0xf4   :  { %295 = vst.msk [vmem:[%s530_s3 + $0x70] sm:$0xff] %vm280_vm1, %v278_v60  ;;  %v268_v1 = vsel %vm236_vm12, %v186_v51, %v252_v57  ;;  %v276_v2 = vsel %vm244_vm13, %v218_v52, %v260_v58  ;;  %vm239_vm14 = vcmp.ge.f32.partialorder %v197_v61, 0.0  ;;  %v255_v5 = vmul.f32 0.2, %v197_v61 }
  0xf5   :  { %285 = vst.msk [vmem:[%s530_s3 + $0x20] sm:$0xff] %vm280_vm1, %v268_v1  ;;  %293 = vst.msk [vmem:[%s530_s3 + $0x60] sm:$0xff] %vm280_vm1, %v276_v2  ;;  %vm247_vm15 = vcmp.ge.f32.partialorder %v229_v62, 0.0  ;;  %v263_v6 = vmul.f32 0.2, %v229_v62  ;;  %vm237_vm0 = vcmp.ge.f32.partialorder %v189_v3, 0.0 }
  0xf6   :  { %v253_v7 = vmul.f32 0.2, %v189_v3  ;;  %vm245_vm2 = vcmp.ge.f32.partialorder %v221_v4, 0.0  ;;  %v261_v8 = vmul.f32 0.2, %v221_v4  ;;  %v271_v9 = vsel %vm239_vm14, %v197_v61, %v255_v5 }
  0xf7   :  { %v279_v10 = vsel %vm247_vm15, %v229_v62, %v263_v6  ;;  %288 = vst.msk [vmem:[%s530_s3 + $0x38] sm:$0xff] %vm280_vm1, %v271_v9 }
  0xf8   :  { %296 = vst.msk [vmem:[%s530_s3 + $0x78] sm:$0xff] %vm280_vm1, %v279_v10  ;;  %v269_v11 = vsel %vm237_vm0, %v189_v3, %v253_v7  ;;  %v277_v12 = vsel %vm245_vm2, %v221_v4, %v261_v8 }
  0xf9   :  { %286 = vst.msk [vmem:[%s530_s3 + $0x28] sm:$0xff] %vm280_vm1, %v269_v11  ;;  %294 = vst.msk [vmem:[%s530_s3 + $0x68] sm:$0xff] %vm280_vm1, %v277_v12 }

// kernel: _encoder_forward.4
= control target key start
LH: loop header
LB: loop body
LE: loop exit
PB: predicated region body
PF: predicated region fallthrough
CT: control target
= control target key end

     0   :  { %vm22_vm0 = vcmask 122880   ;;  %v310_v10 = vmov 0.0   ;;  %vm155_vm1 = vcmask 130048   ;;  %v218_v57 = vlaneseq  ;;  %s428_s1 = inlined_call_operand.vmem [shape: bf16[128,16], index: 1, kind: input, shape index: {}]   ;;  %s429_s0 = inlined_call_operand.vmem [shape: bf16[32,128], index: 0, kind: input, shape index: {}]   ;;  %s430_s4 = inlined_call_operand.vmem [shape: f32[32,16], index: 4, kind: output, shape index: {}]   ;;  %s431_s2 = inlined_call_operand.vmem [shape: f32[1,16], index: 2, kind: input, shape index: {}]   ;;  %s432_s3 = inlined_call_operand.vmem [shape: f32[1,16], index: 3, kind: input, shape index: {}]  }
   0x1   :  { %v298_v0 = vld [vmem:[%s428_s1] sm:$0xff]   ;;  %v299_v1 = vld [vmem:[%s428_s1 + $0x8] sm:$0xff]   ;;  %v300_v2 = vld [vmem:[%s428_s1 + $0x10] sm:$0xff]   ;;  %23 = vst.msk [vmem:[#allocation2] sm:$0x1] %vm22_vm0, %v310_v10 }
   0x2   :  { %277 = vmatprep.subr.bf16.mxu0 %v298_v0  ;;  %v301_v3 = vld [vmem:[%s428_s1 + $0x18] sm:$0xff]   ;;  %v306_v4 = vld [vmem:[%s429_s0] sm:$0xff]   ;;  %v303_v6 = vld [vmem:[%s428_s1 + $0x28] sm:$0xff]   ;;  %24 = vst.msk [vmem:[#allocation3] sm:$0x1] %vm22_vm0, %v310_v10  ;;  %v219_v58 = vshrl.u32 %v218_v57, 7 }
   0x3   :  { %278 = vmatpush3.bf16.msra.mxu0 %v298_v0  ;;  %293 = vmatprep.mubr.bf16.mxu0 %v306_v4  ;;  %v302_v5 = vld [vmem:[%s428_s1 + $0x20] sm:$0xff]   ;;  %v304_v7 = vld [vmem:[%s428_s1 + $0x30] sm:$0xff]   ;;  %v305_v8 = vld [vmem:[%s428_s1 + $0x38] sm:$0xff]  }
   0x4   :  { %279 = vmatprep.subr.bf16.mxu0 %v299_v1  ;;  %v307_v9 = vld [vmem:[%s429_s0 + $0x8] sm:$0xff]   ;;  %v208_v59 = vld [vmem:[%s431_s2] sm:$0x1]  ;;  %v220_v60 = vsub.s32 0, %v219_v58 }
   0x5   :  { %v210_v63 = vld [vmem:[%s432_s3] sm:$0x1] }
   0x7   :  { %280 = vmatpush3.bf16.msra.mxu0 %v299_v1 }
   0x8   :  { %281 = vmatprep.subr.bf16.mxu0 %v300_v2  ;;  %v154_v42 = vld [vmem:[#allocation2] sm:$0x1] }
   0x9   :  { %v172_v45 = vld [vmem:[#allocation3] sm:$0x1] }
   0xb   :  { %282 = vmatpush3.bf16.msra.mxu0 %v300_v2 }
   0xc   :  { %283 = vmatprep.subr.bf16.mxu0 %v301_v3 }
   0xf   :  { %284 = vmatpush3.bf16.msra.mxu0 %v301_v3 }
  0x10   :  { %285 = vmatprep.subr.bf16.mxu0 %v302_v5 }
  0x13   :  { %286 = vmatpush3.bf16.msra.mxu0 %v302_v5 }
  0x14   :  { %287 = vmatprep.subr.bf16.mxu0 %v303_v6 }
  0x17   :  { %288 = vmatpush3.bf16.msra.mxu0 %v303_v6 }
  0x18   :  { %289 = vmatprep.subr.bf16.mxu0 %v304_v7 }
  0x1b   :  { %290 = vmatpush3.bf16.msra.mxu0 %v304_v7 }
  0x1c   :  { %291 = vmatprep.subr.bf16.mxu0 %v305_v8 }
  0x1f   :  { %292 = vmatpush3.bf16.msra.mxu0 %v305_v8 }
  0x22   :  { %294 = vmatmul.mubr.bf16.vlgmr.msra.gmra.mrb[0].mxu0 %v307_v9 }
  0xf5   :  { %v295_v11 = vpop.f32.mrb[0].mxu0 }
  0xf6   :  { %194 = vst.msk [vmem:[%s430_s4 + $0x10] sm:$0xff] %vm155_vm1, %v295_v11  ;;  %v139_v12 = vpop.f32.mrb[1].mxu0  ;;  %v175_v16 = vmul.f32 %v295_v11, %v295_v11  ;;  %v159_v21 = vsel %vm155_vm1, %v295_v11, 0.0 }
  0xf7   :  { %v173_v13 = vmul.f32 %v139_v12, %v139_v12  ;;  %192 = vst.msk [vmem:[%s430_s4] sm:$0xff] %vm155_vm1, %v139_v12  ;;  %v296_v14 = vpop.f32.mrb[2].mxu0  ;;  %v156_v17 = vsel %vm155_vm1, %v139_v12, 0.0 }
  0xf8   :  { %195 = vst.msk [vmem:[%s430_s4 + $0x18] sm:$0xff] %vm155_vm1, %v296_v14  ;;  %v142_v15 = vpop.f32.mrb[3].mxu0  ;;  %v176_v23 = vmul.f32 %v296_v14, %v296_v14  ;;  %v180_v27 = vsel %vm155_vm1, %v175_v16, 0.0  ;;  %v161_v28 = vsel %vm155_vm1, %v296_v14, 0.0 }
  0xf9   :  { %v157_v18 = vsel %vm155_vm1, %v142_v15, 0.0  ;;  %v174_v19 = vmul.f32 %v142_v15, %v142_v15  ;;  %193 = vst.msk [vmem:[%s430_s4 + $0x8] sm:$0xff] %vm155_vm1, %v142_v15  ;;  %v177_v22 = vsel %vm155_vm1, %v173_v13, 0.0 }
  0xfa   :  { %v158_v20 = vadd.f32 %v157_v18, %v156_v17  ;;  %v182_v31 = vsel %vm155_vm1, %v176_v23, 0.0 }
  0xfb   :  { %v178_v24 = vsel %vm155_vm1, %v174_v19, 0.0 }
  0xfc   :  { %v160_v25 = vadd.f32 %v159_v21, %v158_v20  ;;  %v179_v26 = vadd.f32 %v178_v24, %v177_v22 }
  0xfd   :  { %v215_v5 = vld [vmem:[%s430_s4 + $0x10] sm:$0xff] }
  0xfe   :  { %v162_v29 = vadd.f32 %v161_v28, %v160_v25  ;;  %v181_v30 = vadd.f32 %v180_v27, %v179_v26  ;;  %v213_v3 = vld [vmem:[%s430_s4] sm:$0xff] }
  0xff   :  { %v216_v6 = vld [vmem:[%s430_s4 + $0x18] sm:$0xff] }
 0x100   :  { %v163_v32 = vrot.slane %v162_v29, 4  ;;  %v183_v33 = vadd.f32 %v182_v31, %v181_v30  ;;  %v214_v4 = vld [vmem:[%s430_s4 + $0x8] sm:$0xff] }
 0x102   :  { %v164_v34 = vadd.f32 %v163_v32, %v162_v29  ;;  %v184_v35 = vrot.slane %v183_v33, 4 }
 0x104   :  { %v165_v36 = vrot.slane %v164_v34, 2  ;;  %v185_v37 = vadd.f32 %v184_v35, %v183_v33 }
 0x106   :  { %v166_v38 = vadd.f32 %v165_v36, %v164_v34  ;;  %v186_v39 = vrot.slane %v185_v37, 2 }
 0x108   :  { %v167_v40 = vrot.slane %v166_v38, 1  ;;  %v187_v41 = vadd.f32 %v186_v39, %v185_v37 }
 0x10a   :  { %v168_v43 = vadd.f32 %v167_v40, %v166_v38  ;;  %v188_v44 = vrot.slane %v187_v41, 1 }
 0x10c   :  { %v169_v46 = vadd.f32 %v168_v43, %v154_v42  ;;  %v189_v47 = vadd.f32 %v188_v44, %v187_v41 }
 0x10e   :  { %171 = vst.msk [vmem:[#allocation2] sm:$0x1] %vm22_vm0, %v169_v46  ;;  %v190_v48 = vadd.f32 %v189_v47, %v172_v45 }
 0x110   :  { %191 = vst.msk [vmem:[#allocation3] sm:$0x1] %vm22_vm0, %v190_v48 }
 0x115   :  { %v199_v49 = vld [vmem:[#allocation2] sm:$0x1] }
 0x116   :  { %v200_v50 = vmul.f32 0.03125, %v199_v49 }
 0x117   :  { %v201_v51 = vld [vmem:[#allocation3] sm:$0x1] }
 0x118   :  { %v202_v52 = vmul.f32 0.03125, %v201_v51  ;;  %v203_v53 = vmul.f32 %v200_v50, %v200_v50 }
 0x11a   :  { %v204_v54 = vsub.f32 %v202_v52, %v203_v53 }
 0x11c   :  { %v205_v55 = vmax.f32 %v204_v54, 0.0 }
 0x11e   :  { %v206_v56 = vadd.f32 1e-05, %v205_v55 }
 0x120   :  { %308 = vrsqrt.f32 %v206_v56 }
 0x12a   :  { %v309_v61 = vpop.eup %308 }
 0x12b   :  { %v209_v62 = vmul.f32 %v309_v61, %v208_v59 }
 0x12d   :  { %v211_v0 = vmul.f32 %v209_v62, %v200_v50  ;;  %v221_v1 = vrot.slane %v209_v62, %v220_v60 }
 0x12f   :  { %v212_v2 = vsub.f32 %v210_v63, %v211_v0  ;;  %v223_v7 = vmul.f32 %v221_v1, %v213_v3  ;;  %v224_v8 = vmul.f32 %v221_v1, %v214_v4  ;;  %v225_v9 = vmul.f32 %v221_v1, %v215_v5 }
 0x130   :  { %v226_v10 = vmul.f32 %v221_v1, %v216_v6 }
 0x131   :  { %v231_v11 = vrot.slane %v212_v2, %v220_v60 }
 0x133   :  { %v233_v12 = vadd.f32 %v231_v11, %v223_v7  ;;  %v234_v13 = vadd.f32 %v231_v11, %v224_v8  ;;  %v235_v14 = vadd.f32 %v231_v11, %v225_v9  ;;  %v236_v15 = vadd.f32 %v231_v11, %v226_v10 }
 0x135   :  { %vm237_vm2 = vcmp.ge.f32.partialorder %v233_v12, 0.0  ;;  %vm238_vm3 = vcmp.ge.f32.partialorder %v234_v13, 0.0  ;;  %vm239_vm4 = vcmp.ge.f32.partialorder %v235_v14, 0.0  ;;  %vm240_vm5 = vcmp.ge.f32.partialorder %v236_v15, 0.0 }
 0x136   :  { %v241_v16 = vmul.f32 0.2, %v233_v12  ;;  %v242_v17 = vmul.f32 0.2, %v234_v13  ;;  %v243_v18 = vmul.f32 0.2, %v235_v14 }
 0x137   :  { %v244_v19 = vmul.f32 0.2, %v236_v15 }
 0x138   :  { %v245_v20 = vsel %vm237_vm2, %v233_v12, %v241_v16  ;;  %v246_v21 = vsel %vm238_vm3, %v234_v13, %v242_v17  ;;  %v247_v22 = vsel %vm239_vm4, %v235_v14, %v243_v18 }
 0x139   :  { %v248_v23 = vsel %vm240_vm5, %v236_v15, %v244_v19  ;;  %249 = vst.msk [vmem:[%s430_s4] sm:$0xff] %vm155_vm1, %v245_v20  ;;  %250 = vst.msk [vmem:[%s430_s4 + $0x8] sm:$0xff] %vm155_vm1, %v246_v21 }
 0x13a   :  { %251 = vst.msk [vmem:[%s430_s4 + $0x10] sm:$0xff] %vm155_vm1, %v247_v22  ;;  %252 = vst.msk [vmem:[%s430_s4 + $0x18] sm:$0xff] %vm155_vm1, %v248_v23 }

// kernel: _encoder_forward.5
= control target key start
LH: loop header
LB: loop body
LE: loop exit
PB: predicated region body
PF: predicated region fallthrough
CT: control target
= control target key end

     0   :  { %vm22_vm0 = vcmask 253952   ;;  %v326_v19 = vmov 0.0   ;;  %vm202_vm1 = vcmask 261120   ;;  %v244_v52 = vlaneseq  ;;  %s426_s1 = inlined_call_operand.vmem [shape: bf16[256,32], index: 1, kind: input, shape index: {}]   ;;  %s427_s0 = inlined_call_operand.vmem [shape: bf16[8,256], index: 0, kind: input, shape index: {}]   ;;  %s428_s4 = inlined_call_operand.vmem [shape: f32[8,32], index: 4, kind: output, shape index: {}]   ;;  %s429_s2 = inlined_call_operand.vmem [shape: f32[1,32], index: 2, kind: input, shape index: {}]   ;;  %s430_s3 = inlined_call_operand.vmem [shape: f32[1,32], index: 3, kind: input, shape index: {}]  }
   0x1   :  { %v306_v0 = vld [vmem:[%s426_s1 + $0x40] sm:$0xff]   ;;  %v308_v2 = vld [vmem:[%s426_s1 + $0x48] sm:$0xff]   ;;  %v310_v4 = vld [vmem:[%s426_s1 + $0x50] sm:$0xff]   ;;  %23 = vst.msk [vmem:[#allocation2] sm:$0x1] %vm22_vm0, %v326_v19 }
   0x2   :  { %v307_v1 = vld [vmem:[%s426_s1] sm:$0xff]   ;;  %283 = vmatprep.subr.bf16.mxu0 %v306_v0  ;;  %v309_v3 = vld [vmem:[%s426_s1 + $0x8] sm:$0xff]   ;;  %v311_v5 = vld [vmem:[%s426_s1 + $0x10] sm:$0xff]   ;;  %24 = vst.msk [vmem:[#allocation3] sm:$0x1] %vm22_vm0, %v326_v19  ;;  %v245_v53 = vshrl.u32 %v244_v52, 7 }
   0x3   :  { %284 = vmatpush3.bf16.msra.mxu0 %v307_v1  ;;  %v312_v6 = vld [vmem:[%s426_s1 + $0x58] sm:$0xff]   ;;  %v314_v8 = vld [vmem:[%s426_s1 + $0x60] sm:$0xff]   ;;  %v316_v10 = vld [vmem:[%s426_s1 + $0x68] sm:$0xff]  }
   0x4   :  { %285 = vmatprep.subr.bf16.mxu0 %v308_v2  ;;  %v313_v7 = vld [vmem:[%s426_s1 + $0x18] sm:$0xff]   ;;  %v315_v9 = vld [vmem:[%s426_s1 + $0x20] sm:$0xff]   ;;  %v317_v13 = vld [vmem:[%s426_s1 + $0x28] sm:$0xff]   ;;  %v246_v55 = vsub.s32 0, %v245_v53 }
   0x5   :  { %v25_v11 = vld [vmem:[%s427_s0] sm:$0xff]  ;;  %v318_v14 = vld [vmem:[%s426_s1 + $0x70] sm:$0xff]   ;;  %v320_v16 = vld [vmem:[%s426_s1 + $0x78] sm:$0xff]  }
   0x6   :  { %v266_v12 = vcombine.high %v25_v11, %v25_v11  ;;  %v319_v15 = vld [vmem:[%s426_s1 + $0x30] sm:$0xff]   ;;  %v321_v17 = vld [vmem:[%s426_s1 + $0x38] sm:$0xff]   ;;  %v265_v18 = vcombine.low %v25_v11, %v25_v11  ;;  %v237_v54 = vld [vmem:[%s429_s2] sm:$0x1] }
   0x7   :  { %286 = vmatpush3.bf16.msra.mxu0 %v309_v3  ;;  %v239_v58 = vld [vmem:[%s430_s3] sm:$0x1] }
   0x8   :  { %287 = vmatprep.subr.bf16.mxu0 %v310_v4  ;;  %193 = vmatprep.mubr.bf16.mxu0 %v266_v12  ;;  %v201_v37 = vld [vmem:[#allocation2] sm:$0x1] }
   0x9   :  { %v213_v40 = vld [vmem:[#allocation3] sm:$0x1] }
   0xb   :  { %288 = vmatpush3.bf16.msra.mxu0 %v311_v5 }
   0xc   :  { %289 = vmatprep.subr.bf16.mxu0 %v312_v6 }
   0xf   :  { %290 = vmatpush3.bf16.msra.mxu0 %v313_v7 }
  0x10   :  { %291 = vmatprep.subr.bf16.mxu0 %v314_v8 }
  0x13   :  { %292 = vmatpush3.bf16.msra.mxu0 %v315_v9 }
  0x14   :  { %293 = vmatprep.subr.bf16.mxu0 %v316_v10 }
  0x17   :  { %294 = vmatpush3.bf16.msra.mxu0 %v317_v13 }
  0x18   :  { %295 = vmatprep.subr.bf16.mxu0 %v318_v14 }
  0x1b   :  { %296 = vmatpush3.bf16.msra.mxu0 %v319_v15 }
  0x1c   :  { %297 = vmatprep.subr.bf16.mxu0 %v320_v16 }
  0x1f   :  { %298 = vmatpush3.bf16.msra.mxu0 %v321_v17 }
  0x22   :  { %194 = vmatmul.mubr.bf16.vlgmr.msra.gmra.mrb[0].mxu0 %v265_v18 }
  0xf5   :  { %v299_v20 = vpop.f32.mrb[0].mxu0 }
  0xf6   :  { %v300_v21 = vpop.f32.mrb[1].mxu0 }
  0xf7   :  { %v301_v22 = vadd.f32 %v300_v21, %v299_v20  ;;  %v302_v23 = vpop.f32.mrb[2].mxu0 }
  0xf8   :  { %v303_v24 = vpop.f32.mrb[3].mxu0 }
  0xf9   :  { %v203_v25 = vsel %vm202_vm1, %v301_v22, 0.0  ;;  %v214_v26 = vmul.f32 %v301_v22, %v301_v22  ;;  %224 = vst.msk [vmem:[%s428_s4] sm:$0xff] %vm202_vm1, %v301_v22 }
  0xfa   :  { %v204_v27 = vrot.slane %v203_v25, 4 }
  0xfb   :  { %v215_v28 = vsel %vm202_vm1, %v214_v26, 0.0 }
  0xfc   :  { %v205_v29 = vadd.f32 %v204_v27, %v203_v25  ;;  %v216_v30 = vrot.slane %v215_v28, 4 }
  0xfe   :  { %v206_v31 = vrot.slane %v205_v29, 2  ;;  %v217_v32 = vadd.f32 %v216_v30, %v215_v28 }
 0x100   :  { %v207_v33 = vadd.f32 %v206_v31, %v205_v29  ;;  %v218_v34 = vrot.slane %v217_v32, 2  ;;  %v242_v62 = vld [vmem:[%s428_s4] sm:$0xff] }
 0x102   :  { %v208_v35 = vrot.slane %v207_v33, 1  ;;  %v219_v36 = vadd.f32 %v218_v34, %v217_v32 }
 0x104   :  { %v209_v38 = vadd.f32 %v208_v35, %v207_v33  ;;  %v220_v39 = vrot.slane %v219_v36, 1 }
 0x106   :  { %v210_v41 = vadd.f32 %v209_v38, %v201_v37  ;;  %v221_v42 = vadd.f32 %v220_v39, %v219_v36 }
 0x108   :  { %212 = vst.msk [vmem:[#allocation2] sm:$0x1] %vm22_vm0, %v210_v41  ;;  %v222_v43 = vadd.f32 %v221_v42, %v213_v40 }
 0x10a   :  { %223 = vst.msk [vmem:[#allocation3] sm:$0x1] %vm22_vm0, %v222_v43 }
 0x10f   :  { %v228_v44 = vld [vmem:[#allocation2] sm:$0x1] }
 0x110   :  { %v229_v45 = vmul.f32 0.125, %v228_v44 }
 0x111   :  { %v230_v46 = vld [vmem:[#allocation3] sm:$0x1] }
 0x112   :  { %v231_v47 = vmul.f32 0.125, %v230_v46  ;;  %v232_v48 = vmul.f32 %v229_v45, %v229_v45 }
 0x114   :  { %v233_v49 = vsub.f32 %v231_v47, %v232_v48 }
 0x116   :  { %v234_v50 = vmax.f32 %v233_v49, 0.0 }
 0x118   :  { %v235_v51 = vadd.f32 1e-05, %v234_v50 }
 0x11a   :  { %324 = vrsqrt.f32 %v235_v51 }
 0x124   :  { %v325_v56 = vpop.eup %324 }
 0x125   :  { %v238_v57 = vmul.f32 %v325_v56, %v237_v54 }
 0x127   :  { %v240_v59 = vmul.f32 %v238_v57, %v229_v45  ;;  %v247_v60 = vrot.slane %v238_v57, %v246_v55 }
 0x129   :  { %v241_v61 = vsub.f32 %v239_v58, %v240_v59  ;;  %v249_v63 = vmul.f32 %v247_v60, %v242_v62 }
 0x12b   :  { %v254_v0 = vrot.slane %v241_v61, %v246_v55 }
 0x12d   :  { %v256_v1 = vadd.f32 %v254_v0, %v249_v63 }
 0x12f   :  { %vm257_vm2 = vcmp.ge.f32.partialorder %v256_v1, 0.0  ;;  %v258_v2 = vmul.f32 0.2, %v256_v1 }
 0x131   :  { %v259_v3 = vsel %vm257_vm2, %v256_v1, %v258_v2 }
 0x132   :  { %260 = vst.msk [vmem:[%s428_s4] sm:$0xff] %vm202_vm1, %v259_v3 }

</bundles_post_ra>
